<compile_context>
chip_gen: v7x
topology: tpu7x:2x2x1
jax: 0.10.0
libtpu: 0.0.40
codegen_flags: <defaults>
</compile_context>

<pallas_src>
import functools

import jax
import jax.numpy as jnp
from jax.experimental import pallas as pl
from jax.experimental.pallas import tpu as pltpu


def _round_up(x: int, m: int) -> int:
    return ((x + m - 1) // m) * m


def _sublane_align(dtype) -> int:
    # 8 for 4-byte dtypes, 16 for bf16, 32 for int8/fp8 (sublane packing).
    return max(8, 32 // jnp.dtype(dtype).itemsize)


def _largest_divisor_multiple(extent: int, align: int, cap: int) -> int:
    """Largest multiple of `align` that divides `extent` and is <= cap.

    `extent` must itself be a multiple of `align`.
    """
    hi = max(align, min(cap, extent))
    hi -= hi % align
    for t in range(hi, align - 1, -align):
        if extent % t == 0:
            return t
    return align


def _select_tiles(B_pad, N_pad, K_pad, m_align):
    """Pick (tm, tn, tk) as divisors of the minimally-padded extents.

    Caps keep the double-buffered working set around <=12 MiB, which fits
    every TPU generation (v5e/v6e: 128 MiB VMEM, v7x: 64 MiB per TensorCore)
    while being large enough to sit near the HBM roofline.
    """
    TM_CAP, TN_CAP, TK_CAP = 512, 512, 1024

    tk = _largest_divisor_multiple(K_pad, 128, TK_CAP)
    tn = _largest_divisor_multiple(N_pad, 128, TN_CAP)
    if B_pad <= TM_CAP:
        # GEMV / decode-like regime: a single M block streams W exactly once.
        tm = B_pad
    else:
        tm = _largest_divisor_multiple(B_pad, m_align, TM_CAP)

    # v7x shards the "parallel" grid axes across its 2 TensorCores: make sure
    # there are >= 2 parallel blocks whenever the shapes allow it.  Prefer
    # splitting N (each core then streams only half the weights); fall back to
    # splitting M.  Harmless on single-core v5e/v6e.
    if (B_pad // tm == 1) and (N_pad // tn == 1):
        if tn % 256 == 0:
            tn //= 2
        elif tm % (2 * m_align) == 0:
            tm //= 2

    return tm, tn, tk


def _matmul_bias_kernel_f32out(x_ref, w_ref, b_ref, o_ref):
    """f32-output path: accumulate directly into the resident output block.

    x_ref: (tm, tk)  VMEM
    w_ref: (tk, tn)  VMEM   (weights pre-transposed to (K, N))
    b_ref: (1,  tn)  VMEM
    o_ref: (tm, tn)  f32 VMEM (resident across the K grid axis)
    """
    k = pl.program_id(2)

    @pl.when(k == 0)
    def _():
        o_ref[...] = jnp.zeros_like(o_ref)

    o_ref[...] += jnp.dot(
        x_ref[...], w_ref[...], preferred_element_type=jnp.float32
    )

    @pl.when(k == pl.num_programs(2) - 1)
    def _():
        o_ref[...] += b_ref[...].astype(jnp.float32)


def _matmul_bias_kernel_acc(x_ref, w_ref, b_ref, o_ref, acc_ref):
    """Low-precision-output path: f32 VMEM accumulator + cast in the epilogue."""
    k = pl.program_id(2)

    @pl.when(k == 0)
    def _():
        acc_ref[...] = jnp.zeros_like(acc_ref)

    acc_ref[...] += jnp.dot(
        x_ref[...], w_ref[...], preferred_element_type=jnp.float32
    )

    @pl.when(k == pl.num_programs(2) - 1)
    def _():
        o_ref[...] = (acc_ref[...] + b_ref[...].astype(jnp.float32)).astype(
            o_ref.dtype
        )


@functools.partial(jax.jit, static_argnames=("output_size",))
def _fused_column_parallel_linear(x, w_t_pad, b_pad, *, output_size):
    """y = x @ w_t + b.  w_t_pad / b_pad are already padded to (K_pad, N_pad).

    x:       (B, K)
    w_t_pad: (K_pad, N_pad)   -- shard weights concatenated along N, transposed, padded
    b_pad:   (1, N_pad)
    returns  (B, output_size) in x.dtype
    """
    B, K = x.shape
    K_pad, N_pad = w_t_pad.shape
    out_dtype = x.dtype
    m_align = _sublane_align(out_dtype)

    # Only x needs per-call padding (cheap); weights/bias were padded once.
    B_pad = _round_up(B, m_align)
    x_p = x
    if (B_pad, K_pad) != (B, K):
        x_p = jnp.pad(x, ((0, B_pad - B), (0, K_pad - K)))

    tm, tn, tk = _select_tiles(B_pad, N_pad, K_pad, m_align)
    grid = (B_pad // tm, N_pad // tn, K_pad // tk)

    x_bytes = jnp.dtype(x_p.dtype).itemsize
    w_bytes = jnp.dtype(w_t_pad.dtype).itemsize
    o_bytes = jnp.dtype(out_dtype).itemsize

    f32_out = out_dtype == jnp.float32
    if f32_out:
        kernel = _matmul_bias_kernel_f32out
        scratch_shapes = []
        acc_bytes = 0
    else:
        kernel = _matmul_bias_kernel_acc
        scratch_shapes = [pltpu.VMEM((tm, tn), jnp.float32)]
        acc_bytes = tm * tn * 4

    # Double-buffered inputs + output + (optional) accumulator, plus headroom.
    working_set = (
        2 * (tm * tk * x_bytes + tk * tn * w_bytes + tn * w_bytes)
        + 2 * tm * tn * o_bytes
        + acc_bytes
    )
    vmem_limit = int(
        min(48 * 1024 * 1024, max(32 * 1024 * 1024, working_set + 8 * 1024 * 1024))
    )

    cost = pl.CostEstimate(
        flops=2 * B_pad * K_pad * N_pad,
        transcendentals=0,
        bytes_accessed=(
            B_pad * K_pad * x_bytes
            + K_pad * N_pad * w_bytes
            + N_pad * w_bytes
            + B_pad * N_pad * o_bytes
        ),
    )

    y_pad = pl.pallas_call(
        kernel,
        out_shape=jax.ShapeDtypeStruct((B_pad, N_pad), out_dtype),
        grid_spec=pltpu.PrefetchScalarGridSpec(
            num_scalar_prefetch=0,
            grid=grid,
            in_specs=[
                pl.BlockSpec((tm, tk), lambda i, j, k: (i, k)),  # x tile
                pl.BlockSpec((tk, tn), lambda i, j, k: (k, j)),  # W tile (K, N)
                pl.BlockSpec((1, tn), lambda i, j, k: (0, j)),   # bias tile
            ],
            out_specs=pl.BlockSpec((tm, tn), lambda i, j, k: (i, j)),
            scratch_shapes=scratch_shapes,
        ),
        compiler_params=pltpu.CompilerParams(
            dimension_semantics=("parallel", "parallel", "arbitrary"),
            vmem_limit_bytes=vmem_limit,
        ),
        cost_estimate=cost,
    )(x_p, w_t_pad, b_pad)

    if (B_pad, N_pad) != (B, output_size):
        y_pad = y_pad[:B, :output_size]
    return y_pad


class DynamicColumnParallelLinear:
    """JAX/Pallas port of the PyTorch DynamicColumnParallelLinear module.

    The `world_size` shards keep the same init semantics as the torch module,
    but are fused ONCE at construction into a single (K_pad, N_pad)
    pre-transposed, pre-padded weight and a (1, N_pad) bias, so the forward is
    a single tiled Pallas matmul+bias kernel with no per-call weight traffic
    beyond the kernel's own streaming read.
    """

    # TODO(synk): real multi-device column parallelism (torch.distributed /
    # .to(world_rank)) is not modeled; all shards live on one TPU core.
    def __init__(self, input_size, output_size, world_size, key,
                 param_dtype=jnp.float32):
        self.input_size = input_size
        self.output_size = output_size
        self.num_gpus = world_size

        split_sizes = [output_size // world_size for _ in range(world_size)]
        split_sizes[-1] += output_size % world_size
        self.split_sizes = split_sizes

        keys = jax.random.split(key, 2 * world_size)
        # torch.randn -> standard normal init, done deterministically here.
        self.weights = [
            jax.random.normal(keys[2 * i], (split_sizes[i], input_size), jnp.float32)
            for i in range(world_size)
        ]
        # Integer split sizes used directly (the torch module's float-math
        # `int(split/sum*output)` equals split_size but is fragile).
        self.biases = [
            jax.random.normal(keys[2 * i + 1], (split_sizes[i],), jnp.float32)
            for i in range(world_size)
        ]

        # Fuse + pre-transpose + pre-pad ONCE (hoisted out of the forward):
        # concat along the output dim, transpose to (K, N) so the kernel feeds
        # the MXU in canonical (M,K)x(K,N) form, and zero-pad K/N to multiples
        # of 128 so every kernel tile is lane-dense with no per-call pad pass.
        # TODO(synk): param_dtype=jnp.bfloat16 halves weight HBM traffic and
        # uses the native bf16 MXU rate, at an accuracy cost vs the f32 ref.
        w_full = jnp.concatenate(self.weights, axis=0)        # (N, K)
        b_full = jnp.concatenate(self.biases, axis=0)         # (N,)
        K_pad = _round_up(input_size, 128)
        N_pad = _round_up(output_size, 128)
        w_t = jnp.asarray(w_full.T, dtype=param_dtype)        # (K, N)
        self.w_t_pad = jnp.pad(
            w_t, ((0, K_pad - input_size), (0, N_pad - output_size))
        )
        self.b_pad = jnp.pad(
            b_full.astype(param_dtype), (0, N_pad - output_size)
        ).reshape(1, N_pad)

    def __call__(self, x):
        return _fused_column_parallel_linear(
            x, self.w_t_pad, self.b_pad, output_size=self.output_size
        )


def _reference(layer, x):
    w_full = jnp.concatenate(layer.weights, axis=0)   # (output_size, input_size)
    b_full = jnp.concatenate(layer.biases, axis=0)    # (output_size,)
    return (
        jnp.matmul(x, w_full.T, precision=jax.lax.Precision.HIGHEST) + b_full
    )


if __name__ == "__main__":
    key = jax.random.PRNGKey(0)

    # Case 1: small shapes, remainder-on-last-shard path (splits [6, 6, 8]).
    k_x1, k_p1, k_x2, k_p2 = jax.random.split(key, 4)
    batch, input_size, output_size, world_size = 8, 32, 20, 3
    x1 = jax.random.normal(k_x1, (batch, input_size), jnp.float32)
    layer1 = DynamicColumnParallelLinear(input_size, output_size, world_size, k_p1)
    y1 = jax.block_until_ready(layer1(x1))
    y1_ref = _reference(layer1, x1)
    assert y1.shape == (batch, output_size), y1.shape
    assert y1.dtype == x1.dtype, y1.dtype
    assert jnp.allclose(y1, y1_ref, atol=1e-3, rtol=1e-3)

    # Case 2: exercises N/K padding, multiple N tiles and the slice-back.
    batch2, input_size2, output_size2, world_size2 = 24, 200, 1100, 4
    x2 = jax.random.normal(k_x2, (batch2, input_size2), jnp.float32)
    layer2 = DynamicColumnParallelLinear(input_size2, output_size2, world_size2, k_p2)
    y2 = jax.block_until_ready(layer2(x2))
    y2_ref = _reference(layer2, x2)
    assert y2.shape == (batch2, output_size2), y2.shape
    assert jnp.allclose(y2, y2_ref, atol=1e-3, rtol=1e-3)

    print("KERNEL_OK")
</pallas_src>

<mosaic_0001>
module attributes {stable_mosaic.version = 11 : i64} {
  func.func @_matmul_bias_kernel_f32out(%arg0: i32, %arg1: i32, %arg2: i32, %arg3: memref<8x128xf32, #tpu.memory_space<vmem>>, %arg4: memref<128x128xf32, #tpu.memory_space<vmem>>, %arg5: memref<1x128xf32, #tpu.memory_space<vmem>>, %arg6: memref<8x128xf32, #tpu.memory_space<vmem>>) attributes {dimension_semantics = [#tpu.dimension_semantics<parallel>, #tpu.dimension_semantics<parallel>, #tpu.dimension_semantics<arbitrary>], iteration_bounds = array<i64: 1, 1, 1>, scalar_prefetch = 0 : i64, scratch_operands = 0 : i64, tpu.core_type = #tpu.core_type<tc>, window_params = [{transform_indices = @transform_0, window_bounds = array<i64: 8, 128>}, {transform_indices = @transform_1, window_bounds = array<i64: 128, 128>}, {transform_indices = @transform_2, window_bounds = array<i64: 1, 128>}, {transform_indices = @transform_3, window_bounds = array<i64: 8, 128>}]} {
    %c0_i32 = arith.constant 0 : i32
    %0 = arith.cmpi eq, %arg2, %c0_i32 : i32
    %1 = arith.extui %0 : i1 to i32
    %c0_i32_0 = arith.constant 0 : i32
    %2 = arith.cmpi ne, %1, %c0_i32_0 : i32
    scf.if %2 {
      %cst_10 = arith.constant 0.000000e+00 : f32
      %12 = vector.broadcast %cst_10 : f32 to vector<8x128xf32>
      %c0_11 = arith.constant 0 : index
      %c0_12 = arith.constant 0 : index
      %13 = vector.load %arg6[%c0_11, %c0_12] : memref<8x128xf32, #tpu.memory_space<vmem>>, vector<8x128xf32>
      tpu.vector_store %arg6[%c0_11, %c0_12], %12 {strides = array<i32>} : memref<8x128xf32, #tpu.memory_space<vmem>>, vector<8x128xf32>,
    } else {
    }
    %c0 = arith.constant 0 : index
    %c0_1 = arith.constant 0 : index
    %3 = vector.load %arg6[%c0, %c0_1] : memref<8x128xf32, #tpu.memory_space<vmem>>, vector<8x128xf32>
    %c0_2 = arith.constant 0 : index
    %c0_3 = arith.constant 0 : index
    %4 = vector.load %arg3[%c0_2, %c0_3] : memref<8x128xf32, #tpu.memory_space<vmem>>, vector<8x128xf32>
    %c0_4 = arith.constant 0 : index
    %c0_5 = arith.constant 0 : index
    %5 = vector.load %arg4[%c0_4, %c0_5] : memref<128x128xf32, #tpu.memory_space<vmem>>, vector<128x128xf32>
    %cst = arith.constant dense<0.000000e+00> : vector<8x128xf32>
    %6 = tpu.matmul %4, %5, %cst {dimension_numbers = #tpu.dot_dimension_numbers<[1], [0], [0], [1], [0, 0, 1, 1], [], []>} : vector<8x128xf32>, vector<128x128xf32>, vector<8x128xf32> -> vector<8x128xf32>
    %7 = arith.addf %3, %6 : vector<8x128xf32>
    %c0_6 = arith.constant 0 : index
    %c0_7 = arith.constant 0 : index
    %8 = vector.load %arg6[%c0_6, %c0_7] : memref<8x128xf32, #tpu.memory_space<vmem>>, vector<8x128xf32>
    tpu.vector_store %arg6[%c0_6, %c0_7], %7 {strides = array<i32>} : memref<8x128xf32, #tpu.memory_space<vmem>>, vector<8x128xf32>,
    %c0_i32_8 = arith.constant 0 : i32
    %9 = arith.cmpi eq, %arg2, %c0_i32_8 : i32
    %10 = arith.extui %9 : i1 to i32
    %c0_i32_9 = arith.constant 0 : i32
    %11 = arith.cmpi ne, %10, %c0_i32_9 : i32
    scf.if %11 {
      %c0_10 = arith.constant 0 : index
      %c0_11 = arith.constant 0 : index
      %12 = vector.load %arg6[%c0_10, %c0_11] : memref<8x128xf32, #tpu.memory_space<vmem>>, vector<8x128xf32>
      %c0_12 = arith.constant 0 : index
      %c0_13 = arith.constant 0 : index
      %13 = vector.load %arg5[%c0_12, %c0_13] : memref<1x128xf32, #tpu.memory_space<vmem>>, vector<1x128xf32>
      %14 = vector.broadcast %13 : vector<1x128xf32> to vector<8x128xf32>
      %15 = arith.addf %12, %14 : vector<8x128xf32>
      %c0_14 = arith.constant 0 : index
      %c0_15 = arith.constant 0 : index
      %16 = vector.load %arg6[%c0_14, %c0_15] : memref<8x128xf32, #tpu.memory_space<vmem>>, vector<8x128xf32>
      tpu.vector_store %arg6[%c0_14, %c0_15], %15 {strides = array<i32>} : memref<8x128xf32, #tpu.memory_space<vmem>>, vector<8x128xf32>,
    } else {
    }
    return
  }
  func.func @transform_0(%arg0: i32, %arg1: i32, %arg2: i32) -> (i32, i32) {
    %c0_i32 = arith.constant 0 : i32
    return %arg0, %arg2 : i32, i32
  }
  func.func @transform_1(%arg0: i32, %arg1: i32, %arg2: i32) -> (i32, i32) {
    %c0_i32 = arith.constant 0 : i32
    return %arg2, %arg1 : i32, i32
  }
  func.func @transform_2(%arg0: i32, %arg1: i32, %arg2: i32) -> (i32, i32) {
    %c0_i32 = arith.constant 0 : i32
    %c0_i32_0 = arith.constant 0 : i32
    return %c0_i32, %arg1 : i32, i32
  }
  func.func @transform_3(%arg0: i32, %arg1: i32, %arg2: i32) -> (i32, i32) {
    %c0_i32 = arith.constant 0 : i32
    return %arg0, %arg1 : i32, i32
  }
}

</mosaic_0001>

<bundles_post_ra>
// kernel: _fused_column_parallel_linear.1
= control target key start
LH: loop header
LB: loop body
LE: loop exit
PB: predicated region body
PF: predicated region fallthrough
CT: control target
= control target key end

     0   :  { %8 = vsyncpa [#allocation3], 0  ;;  %s341_s0 = inlined_call_operand.vmem [shape: f32[8,128], index: 0, kind: input, shape index: {}]   ;;  %s342_s1 = inlined_call_operand.hbm [shape: f32[128,128], index: 1, kind: input, shape index: {}]   ;;  %s343_s2 = inlined_call_operand.vmem [shape: f32[1,128], index: 2, kind: input, shape index: {}]   ;;  %s344_s3 = inlined_call_operand.hbm [shape: f32[8,128], index: 3, kind: output, shape index: {}]  }
   0x1   :  { %9 = vsyncpa [#allocation4], 0  ;;  %s284_s12 = smov [#allocation2]   ;;  %s236_s16 = scalar_lea.hbm %s342_s1, 2048 }
   0x2   :  { %s17_s13 = sshll.u32 %s284_s12, 4  ;;  %p237_p0 = scmp.ne.s32.totalorder %s342_s1, %s236_s16  ;;  %s18_s13 = int_to_ptr.vmem [resolvable:$true] %s17_s13 }
   0x3   :  { %p240_p1 = scmp.lt.u32.totalorder %s236_s16, %s342_s1 }
   0x5   :  { %p242_p2 = pnand %p240_p1, %p237_p0 }
   0x7   :  { %245 = shalt.err (!%p242_p2)
}
   0x8   :  { %s246_s21 = scalar_lea.vmem %s18_s13, 2048  ;;  %p251_p4 = scmp.lt.s32.totalorder %s18_s13, %s18_s13 }
   0x9   :  { %p247_p3 = scmp.ne.s32.totalorder %s18_s13, %s246_s21  ;;  %p252_p5 = scmp.lt.s32.totalorder %s246_s21, %s246_s21 }
   0xb   :  { %p253_p6 = por %p252_p5, %p251_p4 }
   0xd   :  { %p254_p7 = pnand %p253_p6, %p247_p3 }
   0xf   :  { %257 = shalt.err (!%p254_p7)
}
  0x10   :  { %s285_s22 = smov 128   ;;  %s286_s23 = smov 8  }
  0x11   :  { %23 = dma.hbm_to_vmem [thread:$0]  %s342_s1, 2048, %s18_s13, [#allocation3], %s285_s22, %s285_s22, %s286_s23  }
  0x12   :  { %280 = dma.done.wait [#allocation3], 2048  }
  0x13   :  { %281 = vsyncadd [#allocation3], 4294965248  ;;  %v287_v0 = vmov 0.0|0.0   ;;  %vm288_vm0 = vmmov 0   ;;  %v289_v1 = vmov 0.0   ;;  %v36_v2 = vld [vmem:[#allocation2] sm:$0xff] }
  0x14   :  { %205 = vmatprep.subr.bf16.mxu0 %v287_v0  ;;  %202 = vmatprep.mubr.msk.f32.mxu0 %vm288_vm0, %v289_v1  ;;  %v37_v3 = vld [vmem:[#allocation2 + $0x8] sm:$0xff]  ;;  %v38_v4 = vld [vmem:[#allocation2 + $0x10] sm:$0xff]  ;;  %v39_v6 = vld [vmem:[#allocation2 + $0x18] sm:$0xff]  ;;  %s290_s29 = smov [#allocation5]  }
  0x15   :  { %v206_v5 = vpack.c.bf16 %v37_v3, %v36_v2  ;;  %v209_v7 = vpack.c.bf16 %v39_v6, %v38_v4  ;;  %v40_v8 = vld [vmem:[#allocation2 + $0x20] sm:$0xff]  ;;  %v41_v9 = vld [vmem:[#allocation2 + $0x28] sm:$0xff]  ;;  %v42_v11 = vld [vmem:[#allocation2 + $0x30] sm:$0xff]  ;;  %s143_s30 = sshll.u32 %s290_s29, 4  ;;  %s144_s30 = int_to_ptr.vmem [resolvable:$true] %s143_s30 }
  0x16   :  { %v212_v10 = vpack.c.bf16 %v41_v9, %v40_v8  ;;  %v43_v12 = vld [vmem:[#allocation2 + $0x38] sm:$0xff]  ;;  %v44_v14 = vld [vmem:[#allocation2 + $0x40] sm:$0xff]  ;;  %v45_v15 = vld [vmem:[#allocation2 + $0x48] sm:$0xff]  ;;  %s258_s4 = scalar_lea.vmem %s144_s30, 128  ;;  %p263_p9 = scmp.lt.s32.totalorder %s144_s30, %s144_s30 }
  0x17   :  { %207 = vmatpush3.bf16.msra.mxu0 %v206_v5  ;;  %v215_v13 = vpack.c.bf16 %v43_v12, %v42_v11  ;;  %v218_v16 = vpack.c.bf16 %v45_v15, %v44_v14  ;;  %v46_v17 = vld [vmem:[#allocation2 + $0x50] sm:$0xff]  ;;  %v47_v18 = vld [vmem:[#allocation2 + $0x58] sm:$0xff]  ;;  %v48_v20 = vld [vmem:[#allocation2 + $0x60] sm:$0xff]  ;;  %p259_p8 = scmp.ne.s32.totalorder %s144_s30, %s258_s4  ;;  %p264_p10 = scmp.lt.s32.totalorder %s258_s4, %s258_s4 }
  0x18   :  { %208 = vmatprep.subr.bf16.mxu0 %v287_v0  ;;  %v221_v19 = vpack.c.bf16 %v47_v18, %v46_v17  ;;  %v49_v21 = vld [vmem:[#allocation2 + $0x68] sm:$0xff]  ;;  %v50_v23 = vld [vmem:[#allocation2 + $0x70] sm:$0xff]  ;;  %v51_v24 = vld [vmem:[#allocation2 + $0x78] sm:$0xff] }
  0x19   :  { %v224_v22 = vpack.c.bf16 %v49_v21, %v48_v20  ;;  %v227_v25 = vpack.c.bf16 %v51_v24, %v50_v23  ;;  %v35_v26 = vld [vmem:[%s341_s0] sm:$0xff]  ;;  %p265_p11 = por %p264_p10, %p263_p9 }
  0x1a   :  { %v152_v28 = vld [vmem:[%s343_s2] ss:$0 sm:$0xff] }
  0x1b   :  { %210 = vmatpush3.bf16.msra.mxu0 %v209_v7  ;;  %p266_p12 = pnand %p265_p11, %p259_p8 }
  0x1c   :  { %211 = vmatprep.subr.bf16.mxu0 %v287_v0 }
  0x1f   :  { %213 = vmatpush3.bf16.msra.mxu0 %v212_v10 }
  0x20   :  { %214 = vmatprep.subr.bf16.mxu0 %v287_v0 }
  0x23   :  { %216 = vmatpush3.bf16.msra.mxu0 %v215_v13 }
  0x24   :  { %217 = vmatprep.subr.bf16.mxu0 %v287_v0 }
  0x27   :  { %219 = vmatpush3.bf16.msra.mxu0 %v218_v16 }
  0x28   :  { %220 = vmatprep.subr.bf16.mxu0 %v287_v0 }
  0x2b   :  { %222 = vmatpush3.bf16.msra.mxu0 %v221_v19 }
  0x2c   :  { %223 = vmatprep.subr.bf16.mxu0 %v287_v0 }
  0x2f   :  { %225 = vmatpush3.bf16.msra.mxu0 %v224_v22 }
  0x30   :  { %226 = vmatprep.subr.bf16.mxu0 %v287_v0 }
  0x33   :  { %228 = vmatpush3.bf16.msra.mxu0 %v227_v25 }
  0x36   :  { %203 = vmatmul.mubr.f32.vlgmr.msra.gmra.mrb[0].mxu0 %v35_v26 }
 0x109   :  { %v118_v27 = vpop.f32.mrb[0].mxu0 }
 0x10a   :  { %v204_v29 = vpop.f32.mrb[1].mxu0  ;;  %v135_v30 = vadd.f32 %v152_v28, %v118_v27 }
 0x10c   :  { %136 = vst [vmem:[#allocation5] sm:$0xff] %v135_v30 }
 0x10d   :  { %269 = shalt.err (!%p266_p12)
}
 0x10e   :  { %s270_s6 = scalar_lea.hbm %s344_s3, 128 }
 0x10f   :  { %p271_p13 = scmp.ne.s32.totalorder %s344_s3, %s270_s6  ;;  %p274_p0 = scmp.lt.u32.totalorder %s270_s6, %s344_s3 }
 0x111   :  { %p276_p1 = pnand %p274_p0, %p271_p13 }
 0x113   :  { %279 = shalt.err (!%p276_p1)
}
 0x114   :  { %146 = dma.vmem_to_hbm [thread:$0]  %s144_s30, 128, %s344_s3, [#allocation4]  }
 0x115   :  { %282 = dma.done.wait [#allocation4], 128  }
 0x116   :  { %283 = vsyncadd [#allocation4], 4294967168 }
 0x117   :  { %150 = vsyncpa [#allocation3], 1 }
 0x118   :  { %151 = vsyncpa [#allocation4], 1 }

</bundles_post_ra>
